<compile_context>
chip_gen: v7x
topology: tpu7x:2x2x1
jax: 0.10.0
libtpu: 0.0.40
codegen_flags: <defaults>
</compile_context>

<pallas_src>
import functools
import math

import jax
import jax.numpy as jnp
import numpy as np
from jax.experimental import pallas as pl
from jax.experimental.pallas import tpu as pltpu


def _round_up(x, m):
    return (x + m - 1) // m * m


# ---------------------------------------------------------------------------
# Fused tiled ternary-weight linear: out = [relu](alpha * (x @ sign) + b)
# ---------------------------------------------------------------------------
def _ternary_matmul_kernel(alpha_ref, x_ref, w_ref, b_ref, o_ref, acc_ref, *,
                           apply_relu):
    k = pl.program_id(2)

    @pl.when(k == 0)
    def _():
        acc_ref[...] = jnp.zeros_like(acc_ref)

    # bf16 sign tile (+1/0/-1, exact) cast to f32 to match f32 activations;
    # alpha is applied to the small (tm, tn) output tile at finalize instead
    # of the full (K, N) weight.
    acc_ref[...] += jnp.dot(
        x_ref[...], w_ref[...].astype(jnp.float32),
        preferred_element_type=jnp.float32)

    @pl.when(k == pl.num_programs(2) - 1)
    def _():
        out = alpha_ref[0, 0] * acc_ref[...] + b_ref[...]
        if apply_relu:
            out = jnp.maximum(out, 0.0)
        o_ref[...] = out.astype(o_ref.dtype)


def _ternary_linear_padded(x_p, w_sign_p, b_p, alpha, *, tm, tn, tk,
                           apply_relu):
    """x_p: (M_pad, K_pad) f32, w_sign_p: (K_pad, N_pad) bf16,
    b_p: (1, N_pad) f32, alpha: (1,1) f32  ->  (M_pad, N_pad) f32."""
    M_pad, K_pad = x_p.shape
    _, N_pad = w_sign_p.shape
    grid = (M_pad // tm, N_pad // tn, K_pad // tk)

    kernel = functools.partial(_ternary_matmul_kernel, apply_relu=apply_relu)
    return pl.pallas_call(
        kernel,
        out_shape=jax.ShapeDtypeStruct((M_pad, N_pad), jnp.float32),
        grid=grid,
        in_specs=[
            pl.BlockSpec(memory_space=pltpu.MemorySpace.SMEM),   # alpha (1,1)
            pl.BlockSpec((tm, tk), lambda i, j, k: (i, k)),      # activations
            pl.BlockSpec((tk, tn), lambda i, j, k: (k, j)),      # bf16 sign W
            pl.BlockSpec((1, tn), lambda i, j, k: (0, j)),       # bias row
        ],
        out_specs=pl.BlockSpec((tm, tn), lambda i, j, k: (i, j)),
        scratch_shapes=[pltpu.VMEM((tm, tn), jnp.float32)],
        compiler_params=pltpu.CompilerParams(
            dimension_semantics=("parallel", "parallel", "arbitrary")),
    )(alpha, x_p, w_sign_p, b_p)


# ---------------------------------------------------------------------------
# One-time (init-time) TWN-style ternarization in plain JAX.
# ---------------------------------------------------------------------------
def _ternarize(W):
    absw = jnp.abs(W)
    delta = 0.7 * jnp.mean(absw)
    mask = absw > delta
    nnz = jnp.sum(mask.astype(jnp.float32))
    alpha = jnp.sum(jnp.where(mask, absw, 0.0)) / jnp.maximum(nnz, 1.0)
    sign = jnp.where(mask, jnp.sign(W), 0.0)
    return sign, alpha


class TernaryMLPPallas:
    """Pallas implementation of TernaryMLP's forward pass."""

    TM_MAX = 128
    TN_MAX = 512   # multiple of 256 -> good MXU occupancy on v6e/v7x
    TK_MAX = 512

    def __init__(self, input_shape, output_classes, hidden_layer_count=1,
                 hidden_layer_dim=2048, key=None):
        self.input_shape = tuple(input_shape)
        self.output_classes = output_classes
        self.hidden_layer_count = hidden_layer_count
        self.hidden_layer_dim = hidden_layer_dim

        if key is None:
            key = jax.random.PRNGKey(0)

        in_dims = int(np.prod(self.input_shape))
        dims = []
        out_dims = hidden_layer_dim
        for _ in range(hidden_layer_count):
            dims.append((in_dims, out_dims))
            in_dims = out_dims
        dims.append((in_dims, output_classes))

        self.layers = []
        for fan_in, fan_out in dims:
            key, kw, kb = jax.random.split(key, 3)
            bound = 1.0 / math.sqrt(fan_in)
            W = jax.random.uniform(kw, (fan_in, fan_out), jnp.float32,
                                   -bound, bound)
            b = jax.random.uniform(kb, (fan_out,), jnp.float32, -bound, bound)

            # TODO(synk): TernaryLinear is not defined in the reference file;
            # per-tensor TWN quantization (delta = 0.7*mean|W|) is assumed.
            sign, alpha = _ternarize(W)

            tk = min(self.TK_MAX, _round_up(fan_in, 128))
            tn = min(self.TN_MAX, _round_up(fan_out, 128))
            k_pad = _round_up(fan_in, tk)
            n_pad = _round_up(fan_out, tn)

            # Pre-pad + pre-quantize ONCE (not per forward call).
            w_sign_p = (jnp.zeros((k_pad, n_pad), jnp.bfloat16)
                        .at[:fan_in, :fan_out].set(sign.astype(jnp.bfloat16)))
            b_p = jnp.zeros((1, n_pad), jnp.float32).at[0, :fan_out].set(b)
            alpha_arr = jnp.reshape(alpha.astype(jnp.float32), (1, 1))

            self.layers.append(dict(
                w_sign=w_sign_p, b=b_p, alpha=alpha_arr,
                K=fan_in, N=fan_out, K_pad=k_pad, N_pad=n_pad, tk=tk, tn=tn,
                # full-precision copies kept only for the pure-JAX reference
                W=W, b_raw=b,
            ))

    def __call__(self, x):
        batch = x.shape[0]
        h = x.reshape(batch, -1).astype(jnp.float32)
        tm = min(self.TM_MAX, _round_up(batch, 8))
        m_pad = _round_up(batch, tm)
        n_layers = len(self.layers)
        for idx, layer in enumerate(self.layers):
            apply_relu = idx < n_layers - 1
            k_true = h.shape[1]
            h_p = (jnp.zeros((m_pad, layer["K_pad"]), jnp.float32)
                   .at[:batch, :k_true].set(h))
            out_p = _ternary_linear_padded(
                h_p, layer["w_sign"], layer["b"], layer["alpha"],
                tm=tm, tn=layer["tn"], tk=layer["tk"], apply_relu=apply_relu)
            h = out_p[:batch, :layer["N"]]
        return h

    def reference(self, x):
        """Pure-JAX reference of the same forward pass (correctness check)."""
        batch = x.shape[0]
        h = x.reshape(batch, -1).astype(jnp.float32)
        n_layers = len(self.layers)
        for idx, layer in enumerate(self.layers):
            sign, alpha = _ternarize(layer["W"])
            h = h @ (alpha * sign) + layer["b_raw"]
            if idx < n_layers - 1:
                h = jnp.maximum(h, 0.0)
        return h


if __name__ == "__main__":
    key = jax.random.PRNGKey(0)
    k_x, k_params = jax.random.split(key)

    # Small shapes: batch=2, input_shape=(4,16,16), hidden=32, classes=10.
    input_shape = (4, 16, 16)
    output_classes = 10
    model = TernaryMLPPallas(
        input_shape=input_shape,
        output_classes=output_classes,
        hidden_layer_count=1,
        hidden_layer_dim=32,
        key=k_params,
    )

    x = jax.random.normal(k_x, (2, *input_shape), jnp.float32)
    out = jax.block_until_ready(model(x))
    assert out.shape == (2, output_classes), out.shape
    assert bool(jnp.all(jnp.isfinite(out)))

    ref = jax.block_until_ready(model.reference(x))
    assert bool(jnp.allclose(out, ref, rtol=1e-3, atol=1e-3)), \
        float(jnp.max(jnp.abs(out - ref)))
    print("KERNEL_OK")
</pallas_src>

<mosaic_0001>
module attributes {stable_mosaic.version = 11 : i64} {
  func.func @_ternary_matmul_kernel(%arg0: i32, %arg1: i32, %arg2: i32, %arg3: memref<1x1xf32, #tpu.memory_space<smem>>, %arg4: memref<8x512xf32, #tpu.memory_space<vmem>>, %arg5: memref<512x128xbf16, #tpu.memory_space<vmem>>, %arg6: memref<1x128xf32, #tpu.memory_space<vmem>>, %arg7: memref<8x128xf32, #tpu.memory_space<vmem>>, %arg8: memref<8x128xf32, #tpu.memory_space<vmem>>) attributes {dimension_semantics = [#tpu.dimension_semantics<parallel>, #tpu.dimension_semantics<parallel>, #tpu.dimension_semantics<arbitrary>], iteration_bounds = array<i64: 1, 1, 2>, scalar_prefetch = 0 : i64, scratch_operands = 1 : i64, tpu.core_type = #tpu.core_type<tc>, window_params = [{transform_indices = @transform_0, window_bounds = array<i64: 1, 1>}, {transform_indices = @transform_1, window_bounds = array<i64: 8, 512>}, {transform_indices = @transform_2, window_bounds = array<i64: 512, 128>}, {transform_indices = @transform_3, window_bounds = array<i64: 1, 128>}, {transform_indices = @transform_4, window_bounds = array<i64: 8, 128>}]} {
    %c0_i32 = arith.constant 0 : i32
    %0 = arith.cmpi eq, %arg2, %c0_i32 : i32
    %1 = arith.extui %0 : i1 to i32
    %c0_i32_0 = arith.constant 0 : i32
    %2 = arith.cmpi ne, %1, %c0_i32_0 : i32
    scf.if %2 {
      %cst_9 = arith.constant 0.000000e+00 : f32
      %13 = vector.broadcast %cst_9 : f32 to vector<8x128xf32>
      %c0_10 = arith.constant 0 : index
      %c0_11 = arith.constant 0 : index
      %14 = vector.load %arg8[%c0_10, %c0_11] : memref<8x128xf32, #tpu.memory_space<vmem>>, vector<8x128xf32>
      tpu.vector_store %arg8[%c0_10, %c0_11], %13 {strides = array<i32>} : memref<8x128xf32, #tpu.memory_space<vmem>>, vector<8x128xf32>,
    } else {
    }
    %c0 = arith.constant 0 : index
    %c0_1 = arith.constant 0 : index
    %3 = vector.load %arg8[%c0, %c0_1] : memref<8x128xf32, #tpu.memory_space<vmem>>, vector<8x128xf32>
    %c0_2 = arith.constant 0 : index
    %c0_3 = arith.constant 0 : index
    %4 = vector.load %arg4[%c0_2, %c0_3] : memref<8x512xf32, #tpu.memory_space<vmem>>, vector<8x512xf32>
    %c0_4 = arith.constant 0 : index
    %c0_5 = arith.constant 0 : index
    %5 = vector.load %arg5[%c0_4, %c0_5] : memref<512x128xbf16, #tpu.memory_space<vmem>>, vector<512x128xbf16>
    %6 = arith.extf %5 : vector<512x128xbf16> to vector<512x128xf32>
    %cst = arith.constant dense<0.000000e+00> : vector<8x128xf32>
    %7 = tpu.matmul %4, %6, %cst {dimension_numbers = #tpu.dot_dimension_numbers<[1], [0], [0], [1], [0, 0, 1, 1], [], []>} : vector<8x512xf32>, vector<512x128xf32>, vector<8x128xf32> -> vector<8x128xf32>
    %8 = arith.addf %3, %7 : vector<8x128xf32>
    %c0_6 = arith.constant 0 : index
    %c0_7 = arith.constant 0 : index
    %9 = vector.load %arg8[%c0_6, %c0_7] : memref<8x128xf32, #tpu.memory_space<vmem>>, vector<8x128xf32>
    tpu.vector_store %arg8[%c0_6, %c0_7], %8 {strides = array<i32>} : memref<8x128xf32, #tpu.memory_space<vmem>>, vector<8x128xf32>,
    %c1_i32 = arith.constant 1 : i32
    %10 = arith.cmpi eq, %arg2, %c1_i32 : i32
    %11 = arith.extui %10 : i1 to i32
    %c0_i32_8 = arith.constant 0 : i32
    %12 = arith.cmpi ne, %11, %c0_i32_8 : i32
    scf.if %12 {
      %c0_9 = arith.constant 0 : index
      %c0_10 = arith.constant 0 : index
      %13 = memref.load %arg3[%c0_9, %c0_10] : memref<1x1xf32, #tpu.memory_space<smem>>
      %c0_11 = arith.constant 0 : index
      %c0_12 = arith.constant 0 : index
      %14 = vector.load %arg8[%c0_11, %c0_12] : memref<8x128xf32, #tpu.memory_space<vmem>>, vector<8x128xf32>
      %15 = vector.broadcast %13 : f32 to vector<8x128xf32>
      %16 = arith.mulf %15, %14 : vector<8x128xf32>
      %c0_13 = arith.constant 0 : index
      %c0_14 = arith.constant 0 : index
      %17 = vector.load %arg6[%c0_13, %c0_14] : memref<1x128xf32, #tpu.memory_space<vmem>>, vector<1x128xf32>
      %18 = vector.broadcast %17 : vector<1x128xf32> to vector<8x128xf32>
      %19 = arith.addf %16, %18 : vector<8x128xf32>
      %cst_15 = arith.constant 0.000000e+00 : f32
      %20 = vector.broadcast %cst_15 : f32 to vector<8x128xf32>
      %21 = arith.maximumf %19, %20 : vector<8x128xf32>
      %c0_16 = arith.constant 0 : index
      %c0_17 = arith.constant 0 : index
      %22 = vector.load %arg7[%c0_16, %c0_17] : memref<8x128xf32, #tpu.memory_space<vmem>>, vector<8x128xf32>
      tpu.vector_store %arg7[%c0_16, %c0_17], %21 {strides = array<i32>} : memref<8x128xf32, #tpu.memory_space<vmem>>, vector<8x128xf32>,
    } else {
    }
    return
  }
  func.func @transform_0(%arg0: i32, %arg1: i32, %arg2: i32) -> (i32, i32) {
    %c0_i32 = arith.constant 0 : i32
    %c0_i32_0 = arith.constant 0 : i32
    %c0_i32_1 = arith.constant 0 : i32
    return %c0_i32, %c0_i32_0 : i32, i32
  }
  func.func @transform_1(%arg0: i32, %arg1: i32, %arg2: i32) -> (i32, i32) {
    %c0_i32 = arith.constant 0 : i32
    return %arg0, %arg2 : i32, i32
  }
  func.func @transform_2(%arg0: i32, %arg1: i32, %arg2: i32) -> (i32, i32) {
    %c0_i32 = arith.constant 0 : i32
    return %arg2, %arg1 : i32, i32
  }
  func.func @transform_3(%arg0: i32, %arg1: i32, %arg2: i32) -> (i32, i32) {
    %c0_i32 = arith.constant 0 : i32
    %c0_i32_0 = arith.constant 0 : i32
    return %c0_i32, %arg1 : i32, i32
  }
  func.func @transform_4(%arg0: i32, %arg1: i32, %arg2: i32) -> (i32, i32) {
    %c0_i32 = arith.constant 0 : i32
    return %arg0, %arg1 : i32, i32
  }
}

</mosaic_0001>

<bundles_post_ra>
// kernel: tpu_custom_call.1
= control target key start
LH: loop header
LB: loop body
LE: loop exit
PB: predicated region body
PF: predicated region fallthrough
CT: control target
= control target key end

     0   :  { %s1514_s0 = inlined_call_operand.<no memory space> [shape: f32[1,1], index: 0, kind: input, shape index: {}]   ;;  %s1515_s1 = inlined_call_operand.hbm [shape: f32[8,1024], index: 1, kind: input, shape index: {}]   ;;  %s1516_s2 = inlined_call_operand.hbm [shape: bf16[1024,128], index: 2, kind: input, shape index: {}]   ;;  %s1517_s3 = inlined_call_operand.vmem [shape: f32[1,128], index: 3, kind: input, shape index: {}]   ;;  %s1518_s4 = inlined_call_operand.hbm [shape: f32[8,128], index: 4, kind: output, shape index: {}]  }
   0x1   :  { %9 = sst [smem:[#allocation3]] %s1514_s0 }
   0x2   :  { %10 = vsyncpa [#allocation5], 0 }
   0x3   :  { %12 = vsyncpa [#allocation5 + $0x1], 0 }
   0x4   :  { %13 = vsyncpa [#allocation8], 0 }
   0x5   :  { %15 = vsyncpa [#allocation8 + $0x1], 0 }
   0x6   :  { %16 = vsyncpa [#allocation6], 0  ;;  %s1270_s17 = smov 0   ;;  %s1272_s18 = smov 0  }
   0x7   :  { %s1274_s19 = smov 0   ;;  %s1276_s20 = smov 0  }
   0x8   :  { %s1278_s21 = smov 0   ;;  %s1280_s22 = smov 0  }
   0x9 LB: > { %s705_s0 = sadd.s32 4294967295, %s1234_s22   ;;  %s34_s23 = sadd.s32 1, %s1230_s21  ;;  %s1234_s22 = sphi %s1280_s22, %s22_s22   ;;  %s1230_s21 = sphi %s1278_s21, %s1532_s21   ;;  %s1226_s20 = sphi %s1276_s20, %s1531_s20   ;;  %s1222_s19 = sphi %s1274_s19, %s1530_s19   ;;  %s1218_s18 = sphi %s1272_s18, %s1529_s18   ;;  %s1214_s17 = sphi %s1270_s17, %s1528_s17  }
   0xa   : > { %p35_p0 = scmp.ge.s32.totalorder %s34_s23, 2  ;;  %s71_s24 = sadd.s32 1, %s1222_s19 }
   0xb   : > { %p78_p1 = scmp.ne.s32.totalorder %s1222_s19, %s1218_s18  ;;  %p79_p2 = scmp.eq.s32.totalorder %s1234_s22, 0 }
   0xc   : > { %s1534_s23 = smov (%p35_p0, %s34_s23), 0  ;;  %p84_p4 = scmp.ne.s32.totalorder %s1218_s18, %s1214_s17 }
   0xd   : > { %p1306_p3 = por %p79_p2, %p78_p1  ;;  %s67_s26 = ssub.s32 %s1230_s21, %s1534_s23 }
   0xe   : > { %p85_p5 = scmp.eq.s32.totalorder %s705_s0, 0  ;;  %p69_p6 = scmp.eq.s32.totalorder %s67_s26, 0 }
   0xf   : > { %p1035_p8 = scmp.lt.s32.totalorder %s1234_s22, 2  ;;  %s1324_s29 = sand.u32 1, %s1222_s19  }
  0x10   : > { %p1315_p7 = por %p85_p5, %p84_p4  ;;  %s725_s30 = sshll.u32 %s1230_s21, 9 }
  0x11   : > { %s1321_s28 = scalar_select %p69_p6, %s1222_s19, %s71_s24  }
  0x12   : > { %s1521_s27 = scalar_select %p1315_p7, 1, 0 }
  0x13   : > { %s709_s5 = sshll.u32 %s1324_s29, 5  ;;  %s1331_s8 = scalar_lea.hbm %s1515_s1, %s725_s30 }
  0x14   : > { %s203_s9 = scalar_lea.vmem [#allocation4], %s709_s5  ;;  %p1335_p9 = pnand %p1035_p8, %p1306_p3 }
  0x15   : > { %s213_s10 = sshll.u32 %s203_s9, 4  ;;  %s200_s12 = scalar_lea.sflag [#allocation5], %s1324_s29  ;;  %s1339_s10 = int_to_ptr.vmem [resolvable:$true] %s213_s10 }
  0x16   : > { %s1090_s13 = scalar_lea.hbm %s1331_s8, 512  ;;  %p1092_p13 = pneg %p1335_p9 }
  0x17   : > { %p1091_p12 = scmp.ne.s32.totalorder %s1331_s8, %s1090_s13  ;;  %s1095_s16 = scalar_lea.hbm %s1515_s1, 1024 }
  0x18   : > { %p1096_p2 = scmp.lt.u32.totalorder %s1331_s8, %s1515_s1  ;;  %p1097_p3 = scmp.lt.u32.totalorder %s1095_s16, %s1090_s13 }
  0x19   : > { %p1093_p0 = pnand %p1092_p13, %p1091_p12  ;;  %p1099_p5 = scmp.lt.u32.totalorder %s1090_s13, %s1331_s8 }
  0x1a   : > { %p1098_p4 = por %p1097_p3, %p1096_p2 }
  0x1b   : > { %p1094_p1 = pneg %p1093_p0 }
  0x1c   : > { %p1100_p6 = por %p1099_p5, %p1098_p4 }
  0x1e   : > { %p1101_p8 = pnand %p1100_p6, %p1094_p1 }
  0x20   : > { %1104 = shalt.err (!%p1101_p8)
}
  0x21   : > { %s1105_s25 = scalar_lea.vmem %s1339_s10, 512  ;;  %s1236_s26 = smov [#allocation4]  }
  0x22   : > { %p1106_p12 = scmp.ne.s32.totalorder %s1339_s10, %s1105_s25  ;;  %s1110_s30 = sshll.u32 %s1236_s26, 4  ;;  %s1111_s30 = int_to_ptr.vmem [resolvable:$false] %s1110_s30 }
  0x23   : > { %s1112_s5 = scalar_lea.vmem %s1111_s30, 1024  ;;  %p1113_p11 = scmp.lt.s32.totalorder %s1339_s10, %s1111_s30 }
  0x24   : > { %p1108_p0 = pnand %p1106_p12, %p1092_p13  ;;  %p1114_p2 = scmp.lt.s32.totalorder %s1112_s5, %s1105_s25 }
  0x26   : > { %p1109_p10 = pneg %p1108_p0  ;;  %p1115_p3 = por %p1114_p2, %p1113_p11 }
  0x28   : > { %p1116_p4 = pnand %p1115_p3, %p1109_p10 }
  0x2a   : > { %1119 = shalt.err (!%p1116_p4)
}
  0x2b   : > { %1031 = dma.hbm_to_vmem [thread:$0]  (!%p1335_p9), %s1331_s8, 512, %s1339_s10, %s200_s12  }
  0x2c   : > { %p1523_p1 = scmp.lt.s32.totalorder %s1234_s22, 3  ;;  %p1524_p5 = scmp.ge.s32.totalorder %s1234_s22, 1 }
  0x2d   : > { %s712_s7 = sshll.u32 %s1324_s29, 8  ;;  %s726_s9 = sshll.u32 %s1230_s21, 12 }
  0x2e   : > { %p1373_p6 = pnand %p1524_p5, %p1523_p1  ;;  %s1382_s15 = scalar_lea.hbm %s1516_s2, %s726_s9 }
  0x2f   : > { %s224_s16 = scalar_lea.vmem [#allocation7], %s712_s7  ;;  %s221_s8 = scalar_lea.sflag [#allocation8], %s1324_s29 }
  0x30   : > { %s232_s17 = sshll.u32 %s224_s16, 4  ;;  %s1120_s10 = scalar_lea.hbm %s1382_s15, 4096  ;;  %s1384_s17 = int_to_ptr.vmem [resolvable:$true] %s232_s17 }
  0x31   : > { %p1121_p10 = scmp.ne.s32.totalorder %s1382_s15, %s1120_s10  ;;  %s1125_s25 = scalar_lea.hbm %s1516_s2, 8192 }
  0x32   : > { %p1126_p12 = scmp.lt.u32.totalorder %s1382_s15, %s1516_s2  ;;  %p1127_p0 = scmp.lt.u32.totalorder %s1125_s25, %s1120_s10 }
  0x33   : > { %p1123_p11 = pnand %p1121_p10, %p1092_p13  ;;  %p1129_p3 = scmp.lt.u32.totalorder %s1120_s10, %s1382_s15 }
  0x34   : > { %p1128_p2 = por %p1127_p0, %p1126_p12 }
  0x35   : > { %p1124_p8 = pneg %p1123_p11 }
  0x36   : > { %p1130_p4 = por %p1129_p3, %p1128_p2 }
  0x38   : > { %p1131_p1 = pnand %p1130_p4, %p1124_p8 }
  0x3a   : > { %1134 = shalt.err (!%p1131_p1)
}
  0x3b   : > { %s1135_s5 = scalar_lea.vmem %s1384_s17, 4096  ;;  %s1237_s7 = smov [#allocation7]  }
  0x3c   : > { %p1136_p5 = scmp.ne.s32.totalorder %s1384_s17, %s1135_s5  ;;  %s1140_s9 = sshll.u32 %s1237_s7, 4  ;;  %s1141_s9 = int_to_ptr.vmem [resolvable:$false] %s1140_s9 }
  0x3d   : > { %s1142_s13 = scalar_lea.vmem %s1141_s9, 8192  ;;  %p1143_p7 = scmp.lt.s32.totalorder %s1384_s17, %s1141_s9 }
  0x3e   : > { %p1138_p10 = pnand %p1136_p5, %p1092_p13  ;;  %p1144_p12 = scmp.lt.s32.totalorder %s1142_s13, %s1135_s5 }
  0x40   : > { %p1139_p11 = pneg %p1138_p10  ;;  %p1145_p0 = por %p1144_p12, %p1143_p7 }
  0x42   : > { %p1146_p2 = pnand %p1145_p0, %p1139_p11 }
  0x44   : > { %1149 = shalt.err (!%p1146_p2)
}
  0x45   : > { %s1238_s14 = smov 64   ;;  %s1239_s16 = smov 4  }
  0x46   : > { %1034 = dma.hbm_to_vmem [thread:$0]  (!%p1335_p9), %s1382_s15, 4096, %s1384_s17, %s221_s8, %s1238_s14, %s1238_s14, %s1239_s16  }
  0x47   : > { %244 = sbr.rel (%p1373_p6) target bundleno = 385 (0x181), region = 36  ;;  %s246_s10 = sand.u32 (!%p1373_p6), 1, %s1218_s18  }
  0x48   : > { %s716_s12 = sshll.u32 (!%p1373_p6), %s246_s10, 5  ;;  %s247_s24 = scalar_lea.sflag (!%p1373_p6), [#allocation5], %s246_s10 }
  0x49   : > { %s1415_s25 = scalar_lea.vmem (!%p1373_p6), [#allocation4], %s716_s12  ;;  %p1526_p7 = scmp.ne.s32.totalorder (!%p1373_p6), %s1521_s27, 0 }
  0x4e   : > { %1201 = dma.done.wait (%p1526_p7), %s247_s24, 512  }
  0x4f   : > { %1203 = vsyncadd (%p1526_p7), %s247_s24, 4294966784  ;;  %s717_s26 = sshll.u32 %s246_s10, 8  ;;  %s256_s11 = scalar_lea.sflag [#allocation8], %s246_s10 }
  0x50   : > { %s1421_s29 = scalar_lea.vmem [#allocation7], %s717_s26 }
  0x51   : > { %1205 = dma.done.wait (%p1526_p7), %s256_s11, 4096  }
  0x52   : > { %1207 = vsyncadd (%p1526_p7), %s256_s11, 4294963200  ;;  %p718_p9 = scmp.ne.s32.totalorder %s1226_s20, 0 }
  0x53   : > { %v1240_v0 = vmov (!%p718_p9), 0.0  }
  0x54   : > { %295 = sbr.rel (%p718_p9) target bundleno = 91 (0x5b), region = 48  ;;  %296 = vst [vmem:[#allocation2] sm:$0xff] (!%p718_p9), %v1240_v0 }
  0x5b PF: > { %v862_v1 = vld [vmem:[%s1421_s29 + $0x40] sm:$0xff]   ;;  %v863_v5 = vld [vmem:[%s1421_s29 + $0x48] sm:$0xff]   ;;  %v864_v9 = vld [vmem:[%s1421_s29 + $0x50] sm:$0xff]   ;;  %p719_p13 = scmp.ne.s32.totalorder %s1226_s20, 1 }
  0x5c   : > { %v878_v2 = vld [vmem:[%s1421_s29 + $0xc0] sm:$0xff]   ;;  %957 = vmatprep.subr.bf16.mxu0 %v862_v1  ;;  %v879_v6 = vld [vmem:[%s1421_s29 + $0xc8] sm:$0xff]   ;;  %v880_v10 = vld [vmem:[%s1421_s29 + $0xd0] sm:$0xff]   ;;  %s576_s27 = sld [smem:[#allocation3]] (!%p719_p13) }
  0x5d   : > { %v728_v3 = vld [vmem:[%s1421_s29] sm:$0xff]   ;;  %989 = vmatprep.subr.bf16.mxu1 %v878_v2  ;;  %v855_v7 = vld [vmem:[%s1421_s29 + $0x8] sm:$0xff]   ;;  %v856_v11 = vld [vmem:[%s1421_s29 + $0x10] sm:$0xff]  }
  0x5e   : > { %v870_v4 = vld [vmem:[%s1421_s29 + $0x80] sm:$0xff]   ;;  %959 = vmatpush3.bf16.msra.mxu0 %v728_v3  ;;  %v871_v8 = vld [vmem:[%s1421_s29 + $0x88] sm:$0xff]   ;;  %v872_v12 = vld [vmem:[%s1421_s29 + $0x90] sm:$0xff]  }
  0x5f   : > { %991 = vmatpush3.bf16.msra.mxu1 %v870_v4  ;;  %961 = vmatprep.subr.bf16.mxu0 %v863_v5  ;;  %v865_v13 = vld [vmem:[%s1421_s29 + $0x58] sm:$0xff]   ;;  %v299_v15 = vld [vmem:[%s1415_s25 + $0x8] sm:$0xff]  ;;  %v866_v19 = vld [vmem:[%s1421_s29 + $0x60] sm:$0xff]  }
  0x60   : > { %993 = vmatprep.subr.bf16.mxu1 %v879_v6  ;;  %v881_v14 = vld [vmem:[%s1421_s29 + $0xd8] sm:$0xff]   ;;  %v882_v20 = vld [vmem:[%s1421_s29 + $0xe0] sm:$0xff]   ;;  %494 = vmatprep.mubr.f32.mxu0 %v299_v15  ;;  %v867_v23 = vld [vmem:[%s1421_s29 + $0x68] sm:$0xff]  }
  0x61   : > { %v857_v16 = vld [vmem:[%s1421_s29 + $0x18] sm:$0xff]   ;;  %v858_v21 = vld [vmem:[%s1421_s29 + $0x20] sm:$0xff]   ;;  %v883_v24 = vld [vmem:[%s1421_s29 + $0xe8] sm:$0xff]  }
  0x62   : > { %963 = vmatpush3.bf16.msra.mxu0 %v855_v7  ;;  %v873_v17 = vld [vmem:[%s1421_s29 + $0x98] sm:$0xff]   ;;  %v874_v22 = vld [vmem:[%s1421_s29 + $0xa0] sm:$0xff]   ;;  %v859_v25 = vld [vmem:[%s1421_s29 + $0x28] sm:$0xff]   ;;  %v578_v47 = vstv (!%p719_p13), %s576_s27 }
  0x63   : > { %995 = vmatpush3.bf16.msra.mxu1 %v871_v8  ;;  %965 = vmatprep.subr.bf16.mxu0 %v864_v9  ;;  %v301_v18 = vld [vmem:[%s1415_s25 + $0x18] sm:$0xff]  ;;  %v875_v26 = vld [vmem:[%s1421_s29 + $0xa8] sm:$0xff]   ;;  %v868_v27 = vld [vmem:[%s1421_s29 + $0x70] sm:$0xff]  }
  0x64   : > { %997 = vmatprep.subr.bf16.mxu1 %v880_v10  ;;  %564 = vmatprep.mubr.f32.mxu1 %v301_v18  ;;  %v884_v28 = vld [vmem:[%s1421_s29 + $0xf0] sm:$0xff]   ;;  %v869_v31 = vld [vmem:[%s1421_s29 + $0x78] sm:$0xff]   ;;  %v298_v35 = vld [vmem:[%s1415_s25] sm:$0xff] }
  0x65   : > { %v860_v29 = vld [vmem:[%s1421_s29 + $0x30] sm:$0xff]   ;;  %v885_v32 = vld [vmem:[%s1421_s29 + $0xf8] sm:$0xff]  }
  0x66   : > { %967 = vmatpush3.bf16.msra.mxu0 %v856_v11  ;;  %v876_v30 = vld [vmem:[%s1421_s29 + $0xb0] sm:$0xff]   ;;  %v861_v33 = vld [vmem:[%s1421_s29 + $0x38] sm:$0xff]  }
  0x67   : > { %999 = vmatpush3.bf16.msra.mxu1 %v872_v12  ;;  %969 = vmatprep.subr.bf16.mxu0 %v865_v13  ;;  %v877_v34 = vld [vmem:[%s1421_s29 + $0xb8] sm:$0xff]   ;;  %v300_v36 = vld [vmem:[%s1415_s25 + $0x10] sm:$0xff] }
  0x68   : > { %1001 = vmatprep.subr.bf16.mxu1 %v881_v14  ;;  %v297_v43 = vld [vmem:[#allocation2] sm:$0xff] }
  0x69   : > { %v720_v48 = vld [vmem:[%s1517_s3] ss:$0 sm:$0xff] (!%p719_p13) }
  0x6a   : > { %971 = vmatpush3.bf16.msra.mxu0 %v857_v16 }
  0x6b   : > { %1003 = vmatpush3.bf16.msra.mxu1 %v873_v17  ;;  %973 = vmatprep.subr.bf16.mxu0 %v866_v19 }
  0x6c   : > { %1005 = vmatprep.subr.bf16.mxu1 %v882_v20 }
  0x6e   : > { %975 = vmatpush3.bf16.msra.mxu0 %v858_v21 }
  0x6f   : > { %1007 = vmatpush3.bf16.msra.mxu1 %v874_v22  ;;  %977 = vmatprep.subr.bf16.mxu0 %v867_v23 }
  0x70   : > { %1009 = vmatprep.subr.bf16.mxu1 %v883_v24 }
  0x72   : > { %979 = vmatpush3.bf16.msra.mxu0 %v859_v25 }
  0x73   : > { %1011 = vmatpush3.bf16.msra.mxu1 %v875_v26  ;;  %981 = vmatprep.subr.bf16.mxu0 %v868_v27 }
  0x74   : > { %1013 = vmatprep.subr.bf16.mxu1 %v884_v28 }
  0x76   : > { %983 = vmatpush3.bf16.msra.mxu0 %v860_v29 }
  0x77   : > { %1015 = vmatpush3.bf16.msra.mxu1 %v876_v30  ;;  %985 = vmatprep.subr.bf16.mxu0 %v869_v31 }
  0x78   : > { %1017 = vmatprep.subr.bf16.mxu1 %v885_v32 }
  0x7a   : > { %987 = vmatpush3.bf16.msra.mxu0 %v861_v33 }
  0x7b   : > { %1019 = vmatpush3.bf16.msra.mxu1 %v877_v34 }
  0x7d   : > { %495 = vmatmul.mubr.f32.vlgmr.msra.gmra.mrb[0].mxu0 %v298_v35 }
  0x7e   : > { %565 = vmatmul.mubr.f32.vlgmr.msra.gmra.mrb[0].mxu1 %v300_v36 }
 0x150   : > { %v918_v37 = vpop.f32.mrb[0].mxu0 }
 0x151   : > { %v953_v38 = vpop.f32.mrb[0].mxu1  ;;  %v919_v39 = vpop.f32.mrb[1].mxu0 }
 0x152   : > { %v954_v40 = vpop.f32.mrb[1].mxu1  ;;  %v920_v41 = vadd.f32 %v919_v39, %v918_v37 }
 0x153   : > { %v955_v42 = vadd.f32 %v954_v40, %v953_v38  ;;  %575 = sbr.rel (%p719_p13) target bundleno = 360 (0x168), region = 52 }
 0x155   : > { %v567_v44 = vadd.f32 %v955_v42, %v920_v41 }
 0x157   : > { %v570_v45 = vadd.f32 %v567_v44, %v297_v43 }
 0x159   : > { %571 = vst [vmem:[#allocation2] sm:$0xff] %v570_v45 }
 0x160   : > { %v577_v46 = vld [vmem:[#allocation2] sm:$0xff] }
 0x161   : > { %v579_v49 = vmul.f32 %v578_v47, %v577_v46 }
 0x163   : > { %v587_v50 = vadd.f32 %v720_v48, %v579_v49 }
 0x165   : > { %v588_v51 = vmax.f32 %v587_v50, 0.0 }
 0x167   : > { %589 = vst [vmem:[#allocation9] sm:$0xff] %v588_v51 }
 0x168 PF: > { %p1470_p6 = scmp.eq.s32.totalorder %s705_s0, 1  ;;  %s1241_s20 = smov [#allocation9]  }
 0x169   : > { %s600_s8 = sshll.u32 %s1241_s20, 4  ;;  %s601_s8 = int_to_ptr.vmem [resolvable:$true] %s600_s8 }
 0x16a   : > { %s1150_s30 = scalar_lea.vmem %s601_s8, 128  ;;  %p1157_p1 = scmp.lt.s32.totalorder %s601_s8, %s601_s8 }
 0x16b   : > { %p1151_p8 = scmp.ne.s32.totalorder %s601_s8, %s1150_s30  ;;  %p1158_p5 = scmp.lt.s32.totalorder %s1150_s30, %s1150_s30 }
 0x16d   : > { %p1152_p3 = pnand %p1151_p8, %p1470_p6  ;;  %p1159_p10 = por %p1158_p5, %p1157_p1 }
 0x16f   : > { %p1153_p4 = pneg %p1152_p3 }
 0x171   : > { %p1160_p11 = pnand %p1159_p10, %p1153_p4 }
 0x173   : > { %1163 = shalt.err (!%p1160_p11)
}
 0x174   : > { %s1164_s0 = scalar_lea.hbm %s1518_s4, 128 }
 0x175   : > { %p1165_p12 = scmp.ne.s32.totalorder %s1518_s4, %s1164_s0  ;;  %p1170_p7 = scmp.lt.u32.totalorder %s1164_s0, %s1518_s4 }
 0x177   : > { %p1166_p0 = pnand %p1165_p12, %p1470_p6 }
 0x179   : > { %p1167_p2 = pneg %p1166_p0 }
 0x17b   : > { %p1172_p9 = pnand %p1170_p7, %p1167_p2 }
 0x17d   : > { %1175 = shalt.err (!%p1172_p9)
}
 0x17e   : > { %1025 = dma.vmem_to_hbm [thread:$0]  (%p1470_p6), %s601_s8, 128, %s1518_s4, [#allocation6]  }
 0x17f   : > { %1209 = dma.done.wait (%p1470_p6), [#allocation6], 128  }
 0x180   : > { %1211 = vsyncadd (%p1470_p6), [#allocation6], 4294967168 }
 0x181 PF: > { %s22_s22 = sadd.s32 1, %s1234_s22   ;;  %s1528_s17 = smov %s1218_s18 }
 0x182   : > { %p19_p13 = scmp.ge.s32.totalorder %s22_s22, 4   ;;  %s1529_s18 = smov %s1222_s19 }
 0x183   : > { %s1530_s19 = smov %s1321_s28  ;;  %s1531_s20 = smov %s1230_s21 }
 0x184   : > { %s1532_s21 = smov %s1534_s23  ;;  %21 = sbr.rel (!%p19_p13) target bundleno = 9 (0x9), region = 98 }
 0x18b   :  { %613 = vsyncpa [#allocation5], 1 }
 0x18c   :  { %615 = vsyncpa [#allocation5 + $0x1], 1 }
 0x18d   :  { %616 = vsyncpa [#allocation8], 1 }
 0x18e   :  { %618 = vsyncpa [#allocation8 + $0x1], 1 }
 0x18f   :  { %619 = vsyncpa [#allocation6], 1 }
 0x190   :  { %621 = vsyncpa [#allocation6 + $0x1], 1 }

</bundles_post_ra>
